<compile_context>
chip_gen: v7x
topology: tpu7x:2x2x1
jax: 0.10.0
libtpu: 0.0.40
codegen_flags: <defaults>
</compile_context>

<pallas_src>
import functools

import jax
import jax.numpy as jnp
import numpy as np
from jax import lax
from jax.experimental import pallas as pl
from jax.experimental.pallas import tpu as pltpu


# ------------------------------ small helpers ---------------------------------
def _cdiv(a, b):
    return -(-a // b)


def _round_up(x, m):
    return _cdiv(x, m) * m


def _choose_tile_l(l_out, c_in, c_out, n, stride, budget_bytes=8 << 20):
    """Largest multiple-of-128 length tile that fits a conservative VMEM budget.

    Budget covers double-buffered input core + halo blocks, double-buffered output block,
    the f32 accumulator and the halo-concat copy.  ~8 MiB keeps the kernel comfortably
    inside v7x's scoped VMEM as well as v5e/v6e defaults.
    """
    tl = min(2048, _round_up(max(l_out, 1), 128))
    while tl > 128:
        approx = 4 * (tl * n) * (3 * c_in * stride + 4 * c_out)
        if approx <= budget_bytes:
            break
        tl -= 128
    return max(tl, 128)


# ------------------------------ Pallas kernels ---------------------------------
def _conv_tile(xc_ref, xh_ref, w_ref, *, k_size, dilation, stride, tile_l,
               halo_len, n, mxu_dtype):
    """Conv1d tile via K-tap accumulation.  Returns f32 (Cout, tile_l*n).

    xc_ref: (Cin, tile_l*stride*n)  core input window (length-major, batch-minor lanes)
    xh_ref: (Cin, halo_blk)         head of the next window (halo)
    w_ref : (K, Cout, Cin)          conv weights
    """
    x = xc_ref[...]
    if halo_len > 0:
        x = jnp.concatenate([x, xh_ref[:, : halo_len * n]], axis=-1)
    x = x.astype(mxu_dtype)

    acc = None
    for k in range(k_size):
        wk = w_ref[k].astype(mxu_dtype)                              # (Cout, Cin)
        if stride == 1:
            xk = x[:, k * dilation * n: (k * dilation + tile_l) * n]  # contiguous lanes
        else:
            # TODO(synk): fold the stride into the input DMA window instead of an in-kernel
            # strided subsample; only the last ConvBlock layer can have stride > 1 and the
            # demo config does not exercise this path.
            span = (tile_l - 1) * stride + 1
            x3 = x.reshape(x.shape[0], -1, n)
            xk = x3[:, k * dilation: k * dilation + span: stride, :]
            xk = xk.reshape(x.shape[0], tile_l * n)
        part = jnp.dot(wk, xk, preferred_element_type=jnp.float32)   # (Cout, tile_l*n)
        acc = part if acc is None else acc + part
    return acc


def _bn_stats_kernel(xc_ref, xh_ref, w_ref, sum_ref, sq_ref, *, l_out, **conv_kw):
    """Pass 1: accumulate per-channel sum and sum-of-squares of the conv output."""
    y = _conv_tile(xc_ref, xh_ref, w_ref, **conv_kw)
    tile_l, n = conv_kw["tile_l"], conv_kw["n"]

    i = pl.program_id(0)
    valid_lanes = jnp.clip(l_out - i * tile_l, 0, tile_l) * n        # L-major, N-minor lanes
    lane = lax.broadcasted_iota(jnp.int32, y.shape, 1)
    ym = jnp.where(lane < valid_lanes, y, 0.0)

    @pl.when(i == 0)
    def _():
        sum_ref[...] = jnp.zeros_like(sum_ref)
        sq_ref[...] = jnp.zeros_like(sq_ref)

    sum_ref[...] += jnp.sum(ym, axis=1, keepdims=True)
    sq_ref[...] += jnp.sum(ym * ym, axis=1, keepdims=True)


def _bn_apply_kernel(xc_ref, xh_ref, w_ref, scale_ref, shift_ref, o_ref, *,
                     negative_slope, **conv_kw):
    """Pass 2: recompute the conv tile and apply the pre-folded BN affine + ReLU."""
    y = _conv_tile(xc_ref, xh_ref, w_ref, **conv_kw)
    z = y * scale_ref[...] + shift_ref[...]
    if negative_slope == 0.0:
        z = jnp.maximum(z, 0.0)
    else:
        z = jnp.maximum(z, negative_slope * z)
    o_ref[...] = z.astype(o_ref.dtype)


# ------------------------------ layer wrapper ----------------------------------
def _conv_bn_act_layer(x_cln, w, gamma, beta, *, kernel_size, stride, dilation,
                       eps, negative_slope, mxu_dtype):
    """One Conv1d_layer on a (Cin, L, N)-layout activation.  Returns (Cout, Lout, N)."""
    c_in, l_in, n = x_cln.shape
    c_out = w.shape[0]
    ks = kernel_size

    pad = (ks - 1) * dilation
    l_padded = l_in + pad
    l_out = (l_padded - dilation * (ks - 1) - 1) // stride + 1

    tile_l = _choose_tile_l(l_out, c_in, c_out, n, stride)
    halo_len = max((ks - 1) * dilation - stride + 1, 0)
    halo_blk = _round_up(max(halo_len * n, 1), 128)
    while (tile_l * stride * n) % halo_blk != 0:      # keep the halo block index integral
        tile_l += 128
    n_tiles = _cdiv(l_out, tile_l)
    tls = tile_l * stride                             # input positions consumed per tile
    wc = tls * n                                      # core block width in flattened lanes

    # Reflection 'SAME' pad (cheap XLA glue) + zero pad out to the tiled extent + halo block.
    l_pad = pad // 2
    r_pad = pad - l_pad
    xp = jnp.pad(x_cln, ((0, 0), (l_pad, r_pad), (0, 0)), mode="reflect")
    l_total = n_tiles * tls + _cdiv(halo_blk, n)
    extra = max(l_total - l_padded, 0)
    if extra:
        xp = jnp.pad(xp, ((0, 0), (0, extra), (0, 0)))
    x2 = xp.reshape(c_in, -1)                         # (Cin, L_total*N): L-major, N-minor
    w_t = jnp.transpose(w, (2, 0, 1))                 # (K, Cout, Cin)

    core_spec = pl.BlockSpec((c_in, wc), lambda i: (0, i))
    halo_spec = pl.BlockSpec((c_in, halo_blk),
                             lambda i: (0, (i + 1) * (wc // halo_blk)))
    w_spec = pl.BlockSpec((ks, c_out, c_in), lambda i: (0, 0, 0))
    col_spec = pl.BlockSpec((c_out, 1), lambda i: (0, 0))

    flops = 2 * c_out * c_in * ks * n_tiles * tile_l * n
    x_bytes = x2.size * x2.dtype.itemsize
    w_bytes = w_t.size * w_t.dtype.itemsize
    out_bytes = 4 * c_out * n_tiles * tile_l * n

    conv_kw = dict(k_size=ks, dilation=dilation, stride=stride, tile_l=tile_l,
                   halo_len=halo_len, n=n, mxu_dtype=mxu_dtype)

    # ---- pass 1: batch-norm statistics (reduction over all L tiles) ----
    sum_, sumsq = pl.pallas_call(
        functools.partial(_bn_stats_kernel, l_out=l_out, **conv_kw),
        grid=(n_tiles,),
        in_specs=[core_spec, halo_spec, w_spec],
        out_specs=(col_spec, col_spec),
        out_shape=(jax.ShapeDtypeStruct((c_out, 1), jnp.float32),
                   jax.ShapeDtypeStruct((c_out, 1), jnp.float32)),
        compiler_params=pltpu.CompilerParams(dimension_semantics=("arbitrary",)),
        cost_estimate=pl.CostEstimate(flops=flops, transcendentals=0,
                                      bytes_accessed=x_bytes + w_bytes + 8 * c_out),
    )(x2, x2, w_t)

    # Fold BN (batch stats) + affine into a single per-channel scale/shift.
    # The conv bias is intentionally omitted: BN's mean subtraction cancels it exactly.
    count = n * l_out
    mean = sum_[:, 0] / count
    var = jnp.maximum(sumsq[:, 0] / count - mean * mean, 0.0)
    scale = gamma * lax.rsqrt(var + eps)
    shift = beta - mean * scale

    # ---- pass 2: conv + fused scale/shift + activation, lane-dense tiled output ----
    out2 = pl.pallas_call(
        functools.partial(_bn_apply_kernel, negative_slope=negative_slope, **conv_kw),
        grid=(n_tiles,),
        in_specs=[core_spec, halo_spec, w_spec, col_spec, col_spec],
        out_specs=pl.BlockSpec((c_out, tile_l * n), lambda i: (0, i)),
        out_shape=jax.ShapeDtypeStruct((c_out, n_tiles * tile_l * n), jnp.float32),
        compiler_params=pltpu.CompilerParams(dimension_semantics=("parallel",)),
        cost_estimate=pl.CostEstimate(flops=flops, transcendentals=0,
                                      bytes_accessed=x_bytes + w_bytes + out_bytes),
    )(x2, x2, w_t, scale[:, None], shift[:, None])

    return out2.reshape(c_out, n_tiles * tile_l, n)[:, :l_out, :]


# ------------------------------ ConvBlock wrapper -------------------------------
def conv_block(x, params, *, kernel_size, stride=1, dilation=1, eps=1e-5,
               activation="relu", last_activation="relu", mxu_dtype=jnp.float32):
    """ConvBlock(dimension=1, mode='conv', norm='batch', padding='SAME').

    x: (N, Cin, L) like PyTorch NCL.  params: [(w, b, gamma, beta), ...].
    The conv bias `b` is accepted for API parity but unused (it cancels under
    training-mode BatchNorm).  Set mxu_dtype=jnp.bfloat16 to halve MXU operand
    bandwidth (loosen tolerances if you do).
    """
    n_layers = len(params)
    h = jnp.transpose(x, (1, 2, 0))            # (C, L, N): length/batch on the lane axis
    for i, (w, _b, g, bt) in enumerate(params):
        last = i == n_layers - 1
        act = last_activation if last else activation
        h = _conv_bn_act_layer(
            h, w, g, bt,
            kernel_size=kernel_size,
            stride=stride if last else 1,
            dilation=dilation,
            eps=eps,
            negative_slope=0.0 if act == "relu" else 0.01,
            mxu_dtype=mxu_dtype)
    return jnp.transpose(h, (2, 0, 1))         # back to (N, Cout, Lout)


# ------------------------------ pure-JAX reference ------------------------------
def _ref_block(x, params, *, kernel_size, stride=1, dilation=1):
    n_layers = len(params)
    for i, (w, b, g, bt) in enumerate(params):
        s = stride if i == n_layers - 1 else 1
        pad = (kernel_size - 1) * dilation
        xp = jnp.pad(x, ((0, 0), (0, 0), (pad // 2, pad - pad // 2)), mode="reflect")
        y = lax.conv_general_dilated(
            xp, w, window_strides=(s,), padding="VALID",
            rhs_dilation=(dilation,), dimension_numbers=("NCH", "OIH", "NCH"))
        y = y + b[None, :, None]
        mean = jnp.mean(y, axis=(0, 2), keepdims=True)
        var = jnp.mean((y - mean) ** 2, axis=(0, 2), keepdims=True)
        y = (y - mean) * lax.rsqrt(var + 1e-5)
        y = y * g[None, :, None] + bt[None, :, None]
        x = jnp.maximum(y, 0.0)
    return x


# ------------------------------------ main --------------------------------------
if __name__ == "__main__":
    # ConvBlock(dimension=1, layer_num=2, in_channels=4, out_channels=8, kernel_size=3,
    #           stride=1, padding='SAME', dilation=1, norm='batch',
    #           activation='relu', last_activation='relu', mode='conv')
    N, Cin, L = 2, 4, 16
    layer_num, Cout, K = 2, 8, 3

    key = jax.random.PRNGKey(0)
    kx, *kw = jax.random.split(key, 1 + 2 * layer_num)
    x = jax.random.normal(kx, (N, Cin, L), dtype=jnp.float32)

    params = []
    for i in range(layer_num):
        ci = Cin
        co = Cin if i < layer_num - 1 else Cout
        w = 0.1 * jax.random.normal(kw[2 * i], (co, ci, K), dtype=jnp.float32)
        b = 0.1 * jax.random.normal(kw[2 * i + 1], (co,), dtype=jnp.float32)
        gamma = jnp.ones((co,), jnp.float32)   # BatchNorm1d default affine init
        beta = jnp.zeros((co,), jnp.float32)
        params.append((w, b, gamma, beta))

    fn = jax.jit(functools.partial(conv_block, kernel_size=K, stride=1, dilation=1))
    out = jax.block_until_ready(fn(x, params))

    ref = _ref_block(x, params, kernel_size=K, stride=1, dilation=1)
    np.testing.assert_allclose(np.asarray(out), np.asarray(ref), rtol=1e-3, atol=1e-3)
    assert out.shape == (N, Cout, L)

    print("KERNEL_OK")
</pallas_src>

<mosaic_0001>
module attributes {stable_mosaic.version = 11 : i64} {
  func.func @_bn_stats_kernel(%arg0: i32, %arg1: memref<4x256xf32, #tpu.memory_space<vmem>>, %arg2: memref<4x128xf32, #tpu.memory_space<vmem>>, %arg3: memref<3x4x4xf32, #tpu.memory_space<vmem>>, %arg4: memref<4x1xf32, #tpu.memory_space<vmem>>, %arg5: memref<4x1xf32, #tpu.memory_space<vmem>>) attributes {dimension_semantics = [#tpu.dimension_semantics<arbitrary>], iteration_bounds = array<i64: 1>, scalar_prefetch = 0 : i64, scratch_operands = 0 : i64, tpu.core_type = #tpu.core_type<tc>, window_params = [{transform_indices = @transform_0, window_bounds = array<i64: 4, 256>}, {transform_indices = @transform_1, window_bounds = array<i64: 4, 128>}, {pipeline_mode = #tpu.pipeline_mode<synchronous>, transform_indices = @transform_2, window_bounds = array<i64: 3, 4, 4>}, {pipeline_mode = #tpu.pipeline_mode<synchronous>, transform_indices = @transform_3, window_bounds = array<i64: 4, 1>}, {pipeline_mode = #tpu.pipeline_mode<synchronous>, transform_indices = @transform_4, window_bounds = array<i64: 4, 1>}]} {
    %c0 = arith.constant 0 : index
    %c0_0 = arith.constant 0 : index
    %0 = vector.load %arg1[%c0, %c0_0] : memref<4x256xf32, #tpu.memory_space<vmem>>, vector<4x256xf32>
    %c0_1 = arith.constant 0 : index
    %c0_2 = arith.constant 0 : index
    %1 = vector.load %arg2[%c0_1, %c0_2] : memref<4x128xf32, #tpu.memory_space<vmem>>, vector<4x4xf32>
    %2 = tpu.concatenate %0, %1 in 1 : vector<4x256xf32>, vector<4x4xf32> -> vector<4x260xf32>
    %c0_3 = arith.constant 0 : index
    %c0_4 = arith.constant 0 : index
    %c0_5 = arith.constant 0 : index
    %3 = vector.load %arg3[%c0_3, %c0_4, %c0_5] : memref<3x4x4xf32, #tpu.memory_space<vmem>>, vector<1x4x4xf32>
    %4 = vector.shape_cast %3 : vector<1x4x4xf32> to vector<4x4xf32>
    %5 = vector.extract_strided_slice %2 {offsets = [0, 0], sizes = [4, 256], strides = [1, 1]} : vector<4x260xf32> to vector<4x256xf32>
    %cst = arith.constant dense<0.000000e+00> : vector<4x256xf32>
    %6 = tpu.matmul %4, %5, %cst {dimension_numbers = #tpu.dot_dimension_numbers<[1], [0], [0], [1], [0, 0, 1, 1], [], []>} : vector<4x4xf32>, vector<4x256xf32>, vector<4x256xf32> -> vector<4x256xf32>
    %c1 = arith.constant 1 : index
    %c0_6 = arith.constant 0 : index
    %c0_7 = arith.constant 0 : index
    %7 = vector.load %arg3[%c1, %c0_6, %c0_7] : memref<3x4x4xf32, #tpu.memory_space<vmem>>, vector<1x4x4xf32>
    %8 = vector.shape_cast %7 : vector<1x4x4xf32> to vector<4x4xf32>
    %9 = vector.extract_strided_slice %2 {offsets = [0, 2], sizes = [4, 256], strides = [1, 1]} : vector<4x260xf32> to vector<4x256xf32>
    %cst_8 = arith.constant dense<0.000000e+00> : vector<4x256xf32>
    %10 = tpu.matmul %8, %9, %cst_8 {dimension_numbers = #tpu.dot_dimension_numbers<[1], [0], [0], [1], [0, 0, 1, 1], [], []>} : vector<4x4xf32>, vector<4x256xf32>, vector<4x256xf32> -> vector<4x256xf32>
    %11 = arith.addf %6, %10 : vector<4x256xf32>
    %c2 = arith.constant 2 : index
    %c0_9 = arith.constant 0 : index
    %c0_10 = arith.constant 0 : index
    %12 = vector.load %arg3[%c2, %c0_9, %c0_10] : memref<3x4x4xf32, #tpu.memory_space<vmem>>, vector<1x4x4xf32>
    %13 = vector.shape_cast %12 : vector<1x4x4xf32> to vector<4x4xf32>
    %14 = vector.extract_strided_slice %2 {offsets = [0, 4], sizes = [4, 256], strides = [1, 1]} : vector<4x260xf32> to vector<4x256xf32>
    %cst_11 = arith.constant dense<0.000000e+00> : vector<4x256xf32>
    %15 = tpu.matmul %13, %14, %cst_11 {dimension_numbers = #tpu.dot_dimension_numbers<[1], [0], [0], [1], [0, 0, 1, 1], [], []>} : vector<4x4xf32>, vector<4x256xf32>, vector<4x256xf32> -> vector<4x256xf32>
    %16 = arith.addf %11, %15 : vector<4x256xf32>
    %c128_i32 = arith.constant 128 : i32
    %17 = arith.muli %arg0, %c128_i32 : i32
    %c16_i32 = arith.constant 16 : i32
    %18 = arith.subi %c16_i32, %17 : i32
    %c0_i32 = arith.constant 0 : i32
    %c128_i32_12 = arith.constant 128 : i32
    %19 = arith.maxsi %c0_i32, %18 : i32
    %20 = arith.minsi %c128_i32_12, %19 : i32
    %c2_i32 = arith.constant 2 : i32
    %21 = arith.muli %20, %c2_i32 : i32
    %22 = tpu.iota {dimensions = array<i32: 1>} : vector<4x256xi32>
    %23 = vector.broadcast %21 : i32 to vector<4x256xi32>
    %24 = arith.cmpi slt, %22, %23 : vector<4x256xi32>
    %cst_13 = arith.constant 0.000000e+00 : f32
    %25 = vector.broadcast %cst_13 : f32 to vector<4x256xf32>
    %26 = arith.select %24, %16, %25 : vector<4x256xi1>, vector<4x256xf32>
    %c0_i32_14 = arith.constant 0 : i32
    %27 = arith.cmpi eq, %arg0, %c0_i32_14 : i32
    %28 = arith.extui %27 : i1 to i32
    %c0_i32_15 = arith.constant 0 : i32
    %29 = arith.cmpi ne, %28, %c0_i32_15 : i32
    scf.if %29 {
      %cst_26 = arith.constant 0.000000e+00 : f32
      %41 = vector.broadcast %cst_26 : f32 to vector<4x1xf32>
      %c0_27 = arith.constant 0 : index
      %c0_28 = arith.constant 0 : index
      %42 = vector.load %arg4[%c0_27, %c0_28] : memref<4x1xf32, #tpu.memory_space<vmem>>, vector<4x1xf32>
      tpu.vector_store %arg4[%c0_27, %c0_28], %41 {strides = array<i32>} : memref<4x1xf32, #tpu.memory_space<vmem>>, vector<4x1xf32>,
      %cst_29 = arith.constant 0.000000e+00 : f32
      %43 = vector.broadcast %cst_29 : f32 to vector<4x1xf32>
      %c0_30 = arith.constant 0 : index
      %c0_31 = arith.constant 0 : index
      %44 = vector.load %arg5[%c0_30, %c0_31] : memref<4x1xf32, #tpu.memory_space<vmem>>, vector<4x1xf32>
      tpu.vector_store %arg5[%c0_30, %c0_31], %43 {strides = array<i32>} : memref<4x1xf32, #tpu.memory_space<vmem>>, vector<4x1xf32>,
    } else {
    }
    %c0_16 = arith.constant 0 : index
    %c0_17 = arith.constant 0 : index
    %30 = vector.load %arg4[%c0_16, %c0_17] : memref<4x1xf32, #tpu.memory_space<vmem>>, vector<4x1xf32>
    %cst_18 = arith.constant dense<0.000000e+00> : vector<4xf32>
    %31 = vector.multi_reduction <add>, %26, %cst_18 [1] : vector<4x256xf32> to vector<4xf32>
    %32 = vector.shape_cast %31 : vector<4xf32> to vector<4x1xf32>
    %33 = arith.addf %30, %32 : vector<4x1xf32>
    %c0_19 = arith.constant 0 : index
    %c0_20 = arith.constant 0 : index
    %34 = vector.load %arg4[%c0_19, %c0_20] : memref<4x1xf32, #tpu.memory_space<vmem>>, vector<4x1xf32>
    tpu.vector_store %arg4[%c0_19, %c0_20], %33 {strides = array<i32>} : memref<4x1xf32, #tpu.memory_space<vmem>>, vector<4x1xf32>,
    %c0_21 = arith.constant 0 : index
    %c0_22 = arith.constant 0 : index
    %35 = vector.load %arg5[%c0_21, %c0_22] : memref<4x1xf32, #tpu.memory_space<vmem>>, vector<4x1xf32>
    %36 = arith.mulf %26, %26 : vector<4x256xf32>
    %cst_23 = arith.constant dense<0.000000e+00> : vector<4xf32>
    %37 = vector.multi_reduction <add>, %36, %cst_23 [1] : vector<4x256xf32> to vector<4xf32>
    %38 = vector.shape_cast %37 : vector<4xf32> to vector<4x1xf32>
    %39 = arith.addf %35, %38 : vector<4x1xf32>
    %c0_24 = arith.constant 0 : index
    %c0_25 = arith.constant 0 : index
    %40 = vector.load %arg5[%c0_24, %c0_25] : memref<4x1xf32, #tpu.memory_space<vmem>>, vector<4x1xf32>
    tpu.vector_store %arg5[%c0_24, %c0_25], %39 {strides = array<i32>} : memref<4x1xf32, #tpu.memory_space<vmem>>, vector<4x1xf32>,
    return
  }
  func.func @transform_0(%arg0: i32) -> (i32, i32) {
    %c0_i32 = arith.constant 0 : i32
    %c0_i32_0 = arith.constant 0 : i32
    return %c0_i32, %arg0 : i32, i32
  }
  func.func @transform_1(%arg0: i32) -> (i32, i32) {
    %c1_i32 = arith.constant 1 : i32
    %0 = arith.addi %arg0, %c1_i32 : i32
    %c2_i32 = arith.constant 2 : i32
    %1 = arith.muli %0, %c2_i32 : i32
    %c0_i32 = arith.constant 0 : i32
    %c0_i32_0 = arith.constant 0 : i32
    return %c0_i32, %1 : i32, i32
  }
  func.func @transform_2(%arg0: i32) -> (i32, i32, i32) {
    %c0_i32 = arith.constant 0 : i32
    %c0_i32_0 = arith.constant 0 : i32
    %c0_i32_1 = arith.constant 0 : i32
    %c0_i32_2 = arith.constant 0 : i32
    return %c0_i32, %c0_i32_0, %c0_i32_1 : i32, i32, i32
  }
  func.func @transform_3(%arg0: i32) -> (i32, i32) {
    %c0_i32 = arith.constant 0 : i32
    %c0_i32_0 = arith.constant 0 : i32
    %c0_i32_1 = arith.constant 0 : i32
    return %c0_i32, %c0_i32_0 : i32, i32
  }
  func.func @transform_4(%arg0: i32) -> (i32, i32) {
    %c0_i32 = arith.constant 0 : i32
    %c0_i32_0 = arith.constant 0 : i32
    %c0_i32_1 = arith.constant 0 : i32
    return %c0_i32, %c0_i32_0 : i32, i32
  }
}

module attributes {stable_mosaic.version = 11 : i64} {
  func.func @_bn_apply_kernel(%arg0: i32, %arg1: memref<4x256xf32, #tpu.memory_space<vmem>>, %arg2: memref<4x128xf32, #tpu.memory_space<vmem>>, %arg3: memref<3x4x4xf32, #tpu.memory_space<vmem>>, %arg4: memref<4x1xf32, #tpu.memory_space<vmem>>, %arg5: memref<4x1xf32, #tpu.memory_space<vmem>>, %arg6: memref<4x256xf32, #tpu.memory_space<vmem>>) attributes {dimension_semantics = [#tpu.dimension_semantics<parallel>], iteration_bounds = array<i64: 1>, scalar_prefetch = 0 : i64, scratch_operands = 0 : i64, tpu.core_type = #tpu.core_type<tc>, window_params = [{transform_indices = @transform_0, window_bounds = array<i64: 4, 256>}, {transform_indices = @transform_1, window_bounds = array<i64: 4, 128>}, {pipeline_mode = #tpu.pipeline_mode<synchronous>, transform_indices = @transform_2, window_bounds = array<i64: 3, 4, 4>}, {pipeline_mode = #tpu.pipeline_mode<synchronous>, transform_indices = @transform_3, window_bounds = array<i64: 4, 1>}, {pipeline_mode = #tpu.pipeline_mode<synchronous>, transform_indices = @transform_4, window_bounds = array<i64: 4, 1>}, {transform_indices = @transform_5, window_bounds = array<i64: 4, 256>}]} {
    %c0 = arith.constant 0 : index
    %c0_0 = arith.constant 0 : index
    %0 = vector.load %arg1[%c0, %c0_0] : memref<4x256xf32, #tpu.memory_space<vmem>>, vector<4x256xf32>
    %c0_1 = arith.constant 0 : index
    %c0_2 = arith.constant 0 : index
    %1 = vector.load %arg2[%c0_1, %c0_2] : memref<4x128xf32, #tpu.memory_space<vmem>>, vector<4x4xf32>
    %2 = tpu.concatenate %0, %1 in 1 : vector<4x256xf32>, vector<4x4xf32> -> vector<4x260xf32>
    %c0_3 = arith.constant 0 : index
    %c0_4 = arith.constant 0 : index
    %c0_5 = arith.constant 0 : index
    %3 = vector.load %arg3[%c0_3, %c0_4, %c0_5] : memref<3x4x4xf32, #tpu.memory_space<vmem>>, vector<1x4x4xf32>
    %4 = vector.shape_cast %3 : vector<1x4x4xf32> to vector<4x4xf32>
    %5 = vector.extract_strided_slice %2 {offsets = [0, 0], sizes = [4, 256], strides = [1, 1]} : vector<4x260xf32> to vector<4x256xf32>
    %cst = arith.constant dense<0.000000e+00> : vector<4x256xf32>
    %6 = tpu.matmul %4, %5, %cst {dimension_numbers = #tpu.dot_dimension_numbers<[1], [0], [0], [1], [0, 0, 1, 1], [], []>} : vector<4x4xf32>, vector<4x256xf32>, vector<4x256xf32> -> vector<4x256xf32>
    %c1 = arith.constant 1 : index
    %c0_6 = arith.constant 0 : index
    %c0_7 = arith.constant 0 : index
    %7 = vector.load %arg3[%c1, %c0_6, %c0_7] : memref<3x4x4xf32, #tpu.memory_space<vmem>>, vector<1x4x4xf32>
    %8 = vector.shape_cast %7 : vector<1x4x4xf32> to vector<4x4xf32>
    %9 = vector.extract_strided_slice %2 {offsets = [0, 2], sizes = [4, 256], strides = [1, 1]} : vector<4x260xf32> to vector<4x256xf32>
    %cst_8 = arith.constant dense<0.000000e+00> : vector<4x256xf32>
    %10 = tpu.matmul %8, %9, %cst_8 {dimension_numbers = #tpu.dot_dimension_numbers<[1], [0], [0], [1], [0, 0, 1, 1], [], []>} : vector<4x4xf32>, vector<4x256xf32>, vector<4x256xf32> -> vector<4x256xf32>
    %11 = arith.addf %6, %10 : vector<4x256xf32>
    %c2 = arith.constant 2 : index
    %c0_9 = arith.constant 0 : index
    %c0_10 = arith.constant 0 : index
    %12 = vector.load %arg3[%c2, %c0_9, %c0_10] : memref<3x4x4xf32, #tpu.memory_space<vmem>>, vector<1x4x4xf32>
    %13 = vector.shape_cast %12 : vector<1x4x4xf32> to vector<4x4xf32>
    %14 = vector.extract_strided_slice %2 {offsets = [0, 4], sizes = [4, 256], strides = [1, 1]} : vector<4x260xf32> to vector<4x256xf32>
    %cst_11 = arith.constant dense<0.000000e+00> : vector<4x256xf32>
    %15 = tpu.matmul %13, %14, %cst_11 {dimension_numbers = #tpu.dot_dimension_numbers<[1], [0], [0], [1], [0, 0, 1, 1], [], []>} : vector<4x4xf32>, vector<4x256xf32>, vector<4x256xf32> -> vector<4x256xf32>
    %16 = arith.addf %11, %15 : vector<4x256xf32>
    %c0_12 = arith.constant 0 : index
    %c0_13 = arith.constant 0 : index
    %17 = vector.load %arg4[%c0_12, %c0_13] : memref<4x1xf32, #tpu.memory_space<vmem>>, vector<4x1xf32>
    %18 = vector.broadcast %17 : vector<4x1xf32> to vector<4x256xf32>
    %19 = arith.mulf %16, %18 : vector<4x256xf32>
    %c0_14 = arith.constant 0 : index
    %c0_15 = arith.constant 0 : index
    %20 = vector.load %arg5[%c0_14, %c0_15] : memref<4x1xf32, #tpu.memory_space<vmem>>, vector<4x1xf32>
    %21 = vector.broadcast %20 : vector<4x1xf32> to vector<4x256xf32>
    %22 = arith.addf %19, %21 : vector<4x256xf32>
    %cst_16 = arith.constant 0.000000e+00 : f32
    %23 = vector.broadcast %cst_16 : f32 to vector<4x256xf32>
    %24 = arith.maximumf %22, %23 : vector<4x256xf32>
    %c0_17 = arith.constant 0 : index
    %c0_18 = arith.constant 0 : index
    %25 = vector.load %arg6[%c0_17, %c0_18] : memref<4x256xf32, #tpu.memory_space<vmem>>, vector<4x256xf32>
    tpu.vector_store %arg6[%c0_17, %c0_18], %24 {strides = array<i32>} : memref<4x256xf32, #tpu.memory_space<vmem>>, vector<4x256xf32>,
    return
  }
  func.func @transform_0(%arg0: i32) -> (i32, i32) {
    %c0_i32 = arith.constant 0 : i32
    %c0_i32_0 = arith.constant 0 : i32
    return %c0_i32, %arg0 : i32, i32
  }
  func.func @transform_1(%arg0: i32) -> (i32, i32) {
    %c1_i32 = arith.constant 1 : i32
    %0 = arith.addi %arg0, %c1_i32 : i32
    %c2_i32 = arith.constant 2 : i32
    %1 = arith.muli %0, %c2_i32 : i32
    %c0_i32 = arith.constant 0 : i32
    %c0_i32_0 = arith.constant 0 : i32
    return %c0_i32, %1 : i32, i32
  }
  func.func @transform_2(%arg0: i32) -> (i32, i32, i32) {
    %c0_i32 = arith.constant 0 : i32
    %c0_i32_0 = arith.constant 0 : i32
    %c0_i32_1 = arith.constant 0 : i32
    %c0_i32_2 = arith.constant 0 : i32
    return %c0_i32, %c0_i32_0, %c0_i32_1 : i32, i32, i32
  }
  func.func @transform_3(%arg0: i32) -> (i32, i32) {
    %c0_i32 = arith.constant 0 : i32
    %c0_i32_0 = arith.constant 0 : i32
    %c0_i32_1 = arith.constant 0 : i32
    return %c0_i32, %c0_i32_0 : i32, i32
  }
  func.func @transform_4(%arg0: i32) -> (i32, i32) {
    %c0_i32 = arith.constant 0 : i32
    %c0_i32_0 = arith.constant 0 : i32
    %c0_i32_1 = arith.constant 0 : i32
    return %c0_i32, %c0_i32_0 : i32, i32
  }
  func.func @transform_5(%arg0: i32) -> (i32, i32) {
    %c0_i32 = arith.constant 0 : i32
    %c0_i32_0 = arith.constant 0 : i32
    return %c0_i32, %arg0 : i32, i32
  }
}

module attributes {stable_mosaic.version = 11 : i64} {
  func.func @_bn_stats_kernel(%arg0: i32, %arg1: memref<4x256xf32, #tpu.memory_space<vmem>>, %arg2: memref<4x128xf32, #tpu.memory_space<vmem>>, %arg3: memref<3x8x4xf32, #tpu.memory_space<vmem>>, %arg4: memref<8x1xf32, #tpu.memory_space<vmem>>, %arg5: memref<8x1xf32, #tpu.memory_space<vmem>>) attributes {dimension_semantics = [#tpu.dimension_semantics<arbitrary>], iteration_bounds = array<i64: 1>, scalar_prefetch = 0 : i64, scratch_operands = 0 : i64, tpu.core_type = #tpu.core_type<tc>, window_params = [{transform_indices = @transform_0, window_bounds = array<i64: 4, 256>}, {transform_indices = @transform_1, window_bounds = array<i64: 4, 128>}, {pipeline_mode = #tpu.pipeline_mode<synchronous>, transform_indices = @transform_2, window_bounds = array<i64: 3, 8, 4>}, {pipeline_mode = #tpu.pipeline_mode<synchronous>, transform_indices = @transform_3, window_bounds = array<i64: 8, 1>}, {pipeline_mode = #tpu.pipeline_mode<synchronous>, transform_indices = @transform_4, window_bounds = array<i64: 8, 1>}]} {
    %c0 = arith.constant 0 : index
    %c0_0 = arith.constant 0 : index
    %0 = vector.load %arg1[%c0, %c0_0] : memref<4x256xf32, #tpu.memory_space<vmem>>, vector<4x256xf32>
    %c0_1 = arith.constant 0 : index
    %c0_2 = arith.constant 0 : index
    %1 = vector.load %arg2[%c0_1, %c0_2] : memref<4x128xf32, #tpu.memory_space<vmem>>, vector<4x4xf32>
    %2 = tpu.concatenate %0, %1 in 1 : vector<4x256xf32>, vector<4x4xf32> -> vector<4x260xf32>
    %c0_3 = arith.constant 0 : index
    %c0_4 = arith.constant 0 : index
    %c0_5 = arith.constant 0 : index
    %3 = vector.load %arg3[%c0_3, %c0_4, %c0_5] : memref<3x8x4xf32, #tpu.memory_space<vmem>>, vector<1x8x4xf32>
    %4 = vector.shape_cast %3 : vector<1x8x4xf32> to vector<8x4xf32>
    %5 = vector.extract_strided_slice %2 {offsets = [0, 0], sizes = [4, 256], strides = [1, 1]} : vector<4x260xf32> to vector<4x256xf32>
    %cst = arith.constant dense<0.000000e+00> : vector<8x256xf32>
    %6 = tpu.matmul %4, %5, %cst {dimension_numbers = #tpu.dot_dimension_numbers<[1], [0], [0], [1], [0, 0, 1, 1], [], []>} : vector<8x4xf32>, vector<4x256xf32>, vector<8x256xf32> -> vector<8x256xf32>
    %c1 = arith.constant 1 : index
    %c0_6 = arith.constant 0 : index
    %c0_7 = arith.constant 0 : index
    %7 = vector.load %arg3[%c1, %c0_6, %c0_7] : memref<3x8x4xf32, #tpu.memory_space<vmem>>, vector<1x8x4xf32>
    %8 = vector.shape_cast %7 : vector<1x8x4xf32> to vector<8x4xf32>
    %9 = vector.extract_strided_slice %2 {offsets = [0, 2], sizes = [4, 256], strides = [1, 1]} : vector<4x260xf32> to vector<4x256xf32>
    %cst_8 = arith.constant dense<0.000000e+00> : vector<8x256xf32>
    %10 = tpu.matmul %8, %9, %cst_8 {dimension_numbers = #tpu.dot_dimension_numbers<[1], [0], [0], [1], [0, 0, 1, 1], [], []>} : vector<8x4xf32>, vector<4x256xf32>, vector<8x256xf32> -> vector<8x256xf32>
    %11 = arith.addf %6, %10 : vector<8x256xf32>
    %c2 = arith.constant 2 : index
    %c0_9 = arith.constant 0 : index
    %c0_10 = arith.constant 0 : index
    %12 = vector.load %arg3[%c2, %c0_9, %c0_10] : memref<3x8x4xf32, #tpu.memory_space<vmem>>, vector<1x8x4xf32>
    %13 = vector.shape_cast %12 : vector<1x8x4xf32> to vector<8x4xf32>
    %14 = vector.extract_strided_slice %2 {offsets = [0, 4], sizes = [4, 256], strides = [1, 1]} : vector<4x260xf32> to vector<4x256xf32>
    %cst_11 = arith.constant dense<0.000000e+00> : vector<8x256xf32>
    %15 = tpu.matmul %13, %14, %cst_11 {dimension_numbers = #tpu.dot_dimension_numbers<[1], [0], [0], [1], [0, 0, 1, 1], [], []>} : vector<8x4xf32>, vector<4x256xf32>, vector<8x256xf32> -> vector<8x256xf32>
    %16 = arith.addf %11, %15 : vector<8x256xf32>
    %c128_i32 = arith.constant 128 : i32
    %17 = arith.muli %arg0, %c128_i32 : i32
    %c16_i32 = arith.constant 16 : i32
    %18 = arith.subi %c16_i32, %17 : i32
    %c0_i32 = arith.constant 0 : i32
    %c128_i32_12 = arith.constant 128 : i32
    %19 = arith.maxsi %c0_i32, %18 : i32
    %20 = arith.minsi %c128_i32_12, %19 : i32
    %c2_i32 = arith.constant 2 : i32
    %21 = arith.muli %20, %c2_i32 : i32
    %22 = tpu.iota {dimensions = array<i32: 1>} : vector<8x256xi32>
    %23 = vector.broadcast %21 : i32 to vector<8x256xi32>
    %24 = arith.cmpi slt, %22, %23 : vector<8x256xi32>
    %cst_13 = arith.constant 0.000000e+00 : f32
    %25 = vector.broadcast %cst_13 : f32 to vector<8x256xf32>
    %26 = arith.select %24, %16, %25 : vector<8x256xi1>, vector<8x256xf32>
    %c0_i32_14 = arith.constant 0 : i32
    %27 = arith.cmpi eq, %arg0, %c0_i32_14 : i32
    %28 = arith.extui %27 : i1 to i32
    %c0_i32_15 = arith.constant 0 : i32
    %29 = arith.cmpi ne, %28, %c0_i32_15 : i32
    scf.if %29 {
      %cst_26 = arith.constant 0.000000e+00 : f32
      %41 = vector.broadcast %cst_26 : f32 to vector<8x1xf32>
      %c0_27 = arith.constant 0 : index
      %c0_28 = arith.constant 0 : index
      %42 = vector.load %arg4[%c0_27, %c0_28] : memref<8x1xf32, #tpu.memory_space<vmem>>, vector<8x1xf32>
      tpu.vector_store %arg4[%c0_27, %c0_28], %41 {strides = array<i32>} : memref<8x1xf32, #tpu.memory_space<vmem>>, vector<8x1xf32>,
      %cst_29 = arith.constant 0.000000e+00 : f32
      %43 = vector.broadcast %cst_29 : f32 to vector<8x1xf32>
      %c0_30 = arith.constant 0 : index
      %c0_31 = arith.constant 0 : index
      %44 = vector.load %arg5[%c0_30, %c0_31] : memref<8x1xf32, #tpu.memory_space<vmem>>, vector<8x1xf32>
      tpu.vector_store %arg5[%c0_30, %c0_31], %43 {strides = array<i32>} : memref<8x1xf32, #tpu.memory_space<vmem>>, vector<8x1xf32>,
    } else {
    }
    %c0_16 = arith.constant 0 : index
    %c0_17 = arith.constant 0 : index
    %30 = vector.load %arg4[%c0_16, %c0_17] : memref<8x1xf32, #tpu.memory_space<vmem>>, vector<8x1xf32>
    %cst_18 = arith.constant dense<0.000000e+00> : vector<8xf32>
    %31 = vector.multi_reduction <add>, %26, %cst_18 [1] : vector<8x256xf32> to vector<8xf32>
    %32 = vector.shape_cast %31 : vector<8xf32> to vector<8x1xf32>
    %33 = arith.addf %30, %32 : vector<8x1xf32>
    %c0_19 = arith.constant 0 : index
    %c0_20 = arith.constant 0 : index
    %34 = vector.load %arg4[%c0_19, %c0_20] : memref<8x1xf32, #tpu.memory_space<vmem>>, vector<8x1xf32>
    tpu.vector_store %arg4[%c0_19, %c0_20], %33 {strides = array<i32>} : memref<8x1xf32, #tpu.memory_space<vmem>>, vector<8x1xf32>,
    %c0_21 = arith.constant 0 : index
    %c0_22 = arith.constant 0 : index
    %35 = vector.load %arg5[%c0_21, %c0_22] : memref<8x1xf32, #tpu.memory_space<vmem>>, vector<8x1xf32>
    %36 = arith.mulf %26, %26 : vector<8x256xf32>
    %cst_23 = arith.constant dense<0.000000e+00> : vector<8xf32>
    %37 = vector.multi_reduction <add>, %36, %cst_23 [1] : vector<8x256xf32> to vector<8xf32>
    %38 = vector.shape_cast %37 : vector<8xf32> to vector<8x1xf32>
    %39 = arith.addf %35, %38 : vector<8x1xf32>
    %c0_24 = arith.constant 0 : index
    %c0_25 = arith.constant 0 : index
    %40 = vector.load %arg5[%c0_24, %c0_25] : memref<8x1xf32, #tpu.memory_space<vmem>>, vector<8x1xf32>
    tpu.vector_store %arg5[%c0_24, %c0_25], %39 {strides = array<i32>} : memref<8x1xf32, #tpu.memory_space<vmem>>, vector<8x1xf32>,
    return
  }
  func.func @transform_0(%arg0: i32) -> (i32, i32) {
    %c0_i32 = arith.constant 0 : i32
    %c0_i32_0 = arith.constant 0 : i32
    return %c0_i32, %arg0 : i32, i32
  }
  func.func @transform_1(%arg0: i32) -> (i32, i32) {
    %c1_i32 = arith.constant 1 : i32
    %0 = arith.addi %arg0, %c1_i32 : i32
    %c2_i32 = arith.constant 2 : i32
    %1 = arith.muli %0, %c2_i32 : i32
    %c0_i32 = arith.constant 0 : i32
    %c0_i32_0 = arith.constant 0 : i32
    return %c0_i32, %1 : i32, i32
  }
  func.func @transform_2(%arg0: i32) -> (i32, i32, i32) {
    %c0_i32 = arith.constant 0 : i32
    %c0_i32_0 = arith.constant 0 : i32
    %c0_i32_1 = arith.constant 0 : i32
    %c0_i32_2 = arith.constant 0 : i32
    return %c0_i32, %c0_i32_0, %c0_i32_1 : i32, i32, i32
  }
  func.func @transform_3(%arg0: i32) -> (i32, i32) {
    %c0_i32 = arith.constant 0 : i32
    %c0_i32_0 = arith.constant 0 : i32
    %c0_i32_1 = arith.constant 0 : i32
    return %c0_i32, %c0_i32_0 : i32, i32
  }
  func.func @transform_4(%arg0: i32) -> (i32, i32) {
    %c0_i32 = arith.constant 0 : i32
    %c0_i32_0 = arith.constant 0 : i32
    %c0_i32_1 = arith.constant 0 : i32
    return %c0_i32, %c0_i32_0 : i32, i32
  }
}

module attributes {stable_mosaic.version = 11 : i64} {
  func.func @_bn_apply_kernel(%arg0: i32, %arg1: memref<4x256xf32, #tpu.memory_space<vmem>>, %arg2: memref<4x128xf32, #tpu.memory_space<vmem>>, %arg3: memref<3x8x4xf32, #tpu.memory_space<vmem>>, %arg4: memref<8x1xf32, #tpu.memory_space<vmem>>, %arg5: memref<8x1xf32, #tpu.memory_space<vmem>>, %arg6: memref<8x256xf32, #tpu.memory_space<vmem>>) attributes {dimension_semantics = [#tpu.dimension_semantics<parallel>], iteration_bounds = array<i64: 1>, scalar_prefetch = 0 : i64, scratch_operands = 0 : i64, tpu.core_type = #tpu.core_type<tc>, window_params = [{transform_indices = @transform_0, window_bounds = array<i64: 4, 256>}, {transform_indices = @transform_1, window_bounds = array<i64: 4, 128>}, {pipeline_mode = #tpu.pipeline_mode<synchronous>, transform_indices = @transform_2, window_bounds = array<i64: 3, 8, 4>}, {pipeline_mode = #tpu.pipeline_mode<synchronous>, transform_indices = @transform_3, window_bounds = array<i64: 8, 1>}, {pipeline_mode = #tpu.pipeline_mode<synchronous>, transform_indices = @transform_4, window_bounds = array<i64: 8, 1>}, {transform_indices = @transform_5, window_bounds = array<i64: 8, 256>}]} {
    %c0 = arith.constant 0 : index
    %c0_0 = arith.constant 0 : index
    %0 = vector.load %arg1[%c0, %c0_0] : memref<4x256xf32, #tpu.memory_space<vmem>>, vector<4x256xf32>
    %c0_1 = arith.constant 0 : index
    %c0_2 = arith.constant 0 : index
    %1 = vector.load %arg2[%c0_1, %c0_2] : memref<4x128xf32, #tpu.memory_space<vmem>>, vector<4x4xf32>
    %2 = tpu.concatenate %0, %1 in 1 : vector<4x256xf32>, vector<4x4xf32> -> vector<4x260xf32>
    %c0_3 = arith.constant 0 : index
    %c0_4 = arith.constant 0 : index
    %c0_5 = arith.constant 0 : index
    %3 = vector.load %arg3[%c0_3, %c0_4, %c0_5] : memref<3x8x4xf32, #tpu.memory_space<vmem>>, vector<1x8x4xf32>
    %4 = vector.shape_cast %3 : vector<1x8x4xf32> to vector<8x4xf32>
    %5 = vector.extract_strided_slice %2 {offsets = [0, 0], sizes = [4, 256], strides = [1, 1]} : vector<4x260xf32> to vector<4x256xf32>
    %cst = arith.constant dense<0.000000e+00> : vector<8x256xf32>
    %6 = tpu.matmul %4, %5, %cst {dimension_numbers = #tpu.dot_dimension_numbers<[1], [0], [0], [1], [0, 0, 1, 1], [], []>} : vector<8x4xf32>, vector<4x256xf32>, vector<8x256xf32> -> vector<8x256xf32>
    %c1 = arith.constant 1 : index
    %c0_6 = arith.constant 0 : index
    %c0_7 = arith.constant 0 : index
    %7 = vector.load %arg3[%c1, %c0_6, %c0_7] : memref<3x8x4xf32, #tpu.memory_space<vmem>>, vector<1x8x4xf32>
    %8 = vector.shape_cast %7 : vector<1x8x4xf32> to vector<8x4xf32>
    %9 = vector.extract_strided_slice %2 {offsets = [0, 2], sizes = [4, 256], strides = [1, 1]} : vector<4x260xf32> to vector<4x256xf32>
    %cst_8 = arith.constant dense<0.000000e+00> : vector<8x256xf32>
    %10 = tpu.matmul %8, %9, %cst_8 {dimension_numbers = #tpu.dot_dimension_numbers<[1], [0], [0], [1], [0, 0, 1, 1], [], []>} : vector<8x4xf32>, vector<4x256xf32>, vector<8x256xf32> -> vector<8x256xf32>
    %11 = arith.addf %6, %10 : vector<8x256xf32>
    %c2 = arith.constant 2 : index
    %c0_9 = arith.constant 0 : index
    %c0_10 = arith.constant 0 : index
    %12 = vector.load %arg3[%c2, %c0_9, %c0_10] : memref<3x8x4xf32, #tpu.memory_space<vmem>>, vector<1x8x4xf32>
    %13 = vector.shape_cast %12 : vector<1x8x4xf32> to vector<8x4xf32>
    %14 = vector.extract_strided_slice %2 {offsets = [0, 4], sizes = [4, 256], strides = [1, 1]} : vector<4x260xf32> to vector<4x256xf32>
    %cst_11 = arith.constant dense<0.000000e+00> : vector<8x256xf32>
    %15 = tpu.matmul %13, %14, %cst_11 {dimension_numbers = #tpu.dot_dimension_numbers<[1], [0], [0], [1], [0, 0, 1, 1], [], []>} : vector<8x4xf32>, vector<4x256xf32>, vector<8x256xf32> -> vector<8x256xf32>
    %16 = arith.addf %11, %15 : vector<8x256xf32>
    %c0_12 = arith.constant 0 : index
    %c0_13 = arith.constant 0 : index
    %17 = vector.load %arg4[%c0_12, %c0_13] : memref<8x1xf32, #tpu.memory_space<vmem>>, vector<8x1xf32>
    %18 = vector.broadcast %17 : vector<8x1xf32> to vector<8x256xf32>
    %19 = arith.mulf %16, %18 : vector<8x256xf32>
    %c0_14 = arith.constant 0 : index
    %c0_15 = arith.constant 0 : index
    %20 = vector.load %arg5[%c0_14, %c0_15] : memref<8x1xf32, #tpu.memory_space<vmem>>, vector<8x1xf32>
    %21 = vector.broadcast %20 : vector<8x1xf32> to vector<8x256xf32>
    %22 = arith.addf %19, %21 : vector<8x256xf32>
    %cst_16 = arith.constant 0.000000e+00 : f32
    %23 = vector.broadcast %cst_16 : f32 to vector<8x256xf32>
    %24 = arith.maximumf %22, %23 : vector<8x256xf32>
    %c0_17 = arith.constant 0 : index
    %c0_18 = arith.constant 0 : index
    %25 = vector.load %arg6[%c0_17, %c0_18] : memref<8x256xf32, #tpu.memory_space<vmem>>, vector<8x256xf32>
    tpu.vector_store %arg6[%c0_17, %c0_18], %24 {strides = array<i32>} : memref<8x256xf32, #tpu.memory_space<vmem>>, vector<8x256xf32>,
    return
  }
  func.func @transform_0(%arg0: i32) -> (i32, i32) {
    %c0_i32 = arith.constant 0 : i32
    %c0_i32_0 = arith.constant 0 : i32
    return %c0_i32, %arg0 : i32, i32
  }
  func.func @transform_1(%arg0: i32) -> (i32, i32) {
    %c1_i32 = arith.constant 1 : i32
    %0 = arith.addi %arg0, %c1_i32 : i32
    %c2_i32 = arith.constant 2 : i32
    %1 = arith.muli %0, %c2_i32 : i32
    %c0_i32 = arith.constant 0 : i32
    %c0_i32_0 = arith.constant 0 : i32
    return %c0_i32, %1 : i32, i32
  }
  func.func @transform_2(%arg0: i32) -> (i32, i32, i32) {
    %c0_i32 = arith.constant 0 : i32
    %c0_i32_0 = arith.constant 0 : i32
    %c0_i32_1 = arith.constant 0 : i32
    %c0_i32_2 = arith.constant 0 : i32
    return %c0_i32, %c0_i32_0, %c0_i32_1 : i32, i32, i32
  }
  func.func @transform_3(%arg0: i32) -> (i32, i32) {
    %c0_i32 = arith.constant 0 : i32
    %c0_i32_0 = arith.constant 0 : i32
    %c0_i32_1 = arith.constant 0 : i32
    return %c0_i32, %c0_i32_0 : i32, i32
  }
  func.func @transform_4(%arg0: i32) -> (i32, i32) {
    %c0_i32 = arith.constant 0 : i32
    %c0_i32_0 = arith.constant 0 : i32
    %c0_i32_1 = arith.constant 0 : i32
    return %c0_i32, %c0_i32_0 : i32, i32
  }
  func.func @transform_5(%arg0: i32) -> (i32, i32) {
    %c0_i32 = arith.constant 0 : i32
    %c0_i32_0 = arith.constant 0 : i32
    return %c0_i32, %arg0 : i32, i32
  }
}

</mosaic_0001>

<bundles_post_ra>
// kernel: conv_block.5
= control target key start
LH: loop header
LB: loop body
LE: loop exit
PB: predicated region body
PF: predicated region fallthrough
CT: control target
= control target key end

     0   :  { %vm63_vm0 = vcmask 1043456   ;;  %v364_v2 = vmov 0.0   ;;  %s365_s22 = smov 124   ;;  %s366_s23 = smov 126   ;;  %v367_v4 = vmov 0   ;;  %vm59_vm1 = vcmask 31744   ;;  %s431_s1 = inlined_call_operand.vmem [shape: f32[4,384], index: 1, kind: input, shape index: {}, may-alias: {0,1}]   ;;  %s432_s0 = inlined_call_operand.vmem [shape: f32[4,384], index: 0, kind: input, shape index: {}, may-alias: {0,1}]   ;;  %s433_s2 = inlined_call_operand.vmem [shape: f32[3,4,4], index: 2, kind: input, shape index: {}]   ;;  %s434_s3 = inlined_call_operand.vmem [shape: f32[4,1], index: 3, kind: input, shape index: {}]   ;;  %s435_s4 = inlined_call_operand.vmem [shape: f32[4,1], index: 4, kind: input, shape index: {}]   ;;  %s436_s5 = inlined_call_operand.vmem [shape: f32[4,256], index: 5, kind: output, shape index: {}]  }
   0x1   :  { %v341_v0 = vld [vmem:[%s431_s1 + $0x8] sm:$0xf]  ;;  %v42_v1 = vld [vmem:[%s432_s0] sm:$0xff]  ;;  %210 = vmatprep.mubr.f32.mxu0 %v364_v2  ;;  %132 = vmatprep.mubr.f32.mxu1 %v364_v2  ;;  %vm225_vm2 = vcmask 1014784   ;;  %vm56_vm3 = vcmask 1031168  }
   0x2   :  { %223 = vrot.lane.b32.xlu1 %v341_v0, %s365_s22  ;;  %54 = vrot.lane.b32.xlu0 %v341_v0, %s366_s23  ;;  %v45_v3 = vcombine.high %v42_v1, %v42_v1  ;;  %v46_v5 = vld [vmem:[%s433_s2] sm:$0xf]  ;;  %v342_v16 = vld [vmem:[%s433_s2 + $0x4] sm:$0xf] }
   0x3   :  { %361 = vset.pattern.permute.xlu0 %v367_v4  ;;  %362 = vset.pattern.permute.xlu1 %v367_v4  ;;  %v308_v6 = vld [vmem:[%s434_s3] sm:$0xf]  ;;  %v349_v17 = vld [vmem:[%s433_s2 + $0x8] sm:$0xf] }
   0x4   :  { %346 = vmatprep.subr.msk.mxu0 %vm63_vm0, %v45_v3  ;;  %v316_v7 = vld [vmem:[%s435_s4] sm:$0xf] }
   0x5   :  { %347 = vmatpush1.msk.msra.mxu0 %vm63_vm0, %v42_v1 }
   0x6   :  { %221 = vrot.lane.b32.xlu1 %v45_v3, %s365_s22  ;;  %52 = vrot.lane.b32.xlu0 %v45_v3, %s366_s23 }
   0x7   :  { %348 = vmatmul.mubr.msk.f32.vlgmr.msra.gmra.mrb[0].mxu0 %vm59_vm1, %v46_v5 }
   0x8   :  { %299 = vmatprep.mubr.f32.mxu0 %v364_v2 }
   0xa   :  { %219 = vrot.lane.b32.xlu1 %v42_v1, %s365_s22  ;;  %50 = vrot.lane.b32.xlu0 %v42_v1, %s366_s23 }
   0xe   :  { %311 = vperm.xlu0 %361, %v308_v6   ;;  %319 = vperm.xlu1 %362, %v316_v7  }
  0x74   :  { %v224_v8 = vpop.permute.xlu1 %223  ;;  %v55_v9 = vpop.permute.xlu0 %54 }
  0x78   :  { %v222_v10 = vpop.permute.xlu1 %221  ;;  %v53_v11 = vpop.permute.xlu0 %52 }
  0x79   :  { %v227_v12 = vsel %vm225_vm2, %v222_v10, %v224_v8  ;;  %v58_v13 = vsel %vm56_vm3, %v53_v11, %v55_v9 }
  0x7a   :  { %350 = vmatprep.subr.msk.mxu0 %vm63_vm0, %v227_v12  ;;  %343 = vmatprep.subr.msk.mxu1 %vm63_vm0, %v58_v13 }
  0x7c   :  { %v220_v14 = vpop.permute.xlu1 %219  ;;  %v51_v15 = vpop.permute.xlu0 %50 }
  0x7d   :  { %v226_v18 = vsel %vm225_vm2, %v220_v14, %v222_v10  ;;  %v57_v19 = vsel %vm56_vm3, %v51_v15, %v53_v11 }
  0x7e   :  { %344 = vmatpush1.msk.msra.mxu1 %vm63_vm0, %v57_v19  ;;  %351 = vmatpush1.msk.msra.mxu0 %vm63_vm0, %v226_v18 }
  0x7f   :  { %345 = vmatmul.mubr.msk.f32.vlgmr.msra.gmra.mrb[0].mxu1 %vm59_vm1, %v342_v16  ;;  %352 = vmatmul.mubr.msk.f32.vlgmr.msra.gmra.mrb[0].mxu0 %vm59_vm1, %v349_v17 }
  0x8d   :  { %v312_v20 = vpop.permute.xlu0 %311  ;;  %v320_v27 = vpop.permute.xlu1 %319 }
 0x152   :  { %v134_v21 = vpop.f32.mrb[0].mxu1  ;;  %v301_v22 = vpop.f32.mrb[0].mxu0 }
 0x153   :  { %v353_v23 = vadd.f32 %v301_v22, %v134_v21  ;;  %v136_v24 = vpop.f32.mrb[1].mxu1  ;;  %v303_v25 = vpop.f32.mrb[1].mxu0 }
 0x154   :  { %v354_v26 = vadd.f32 %v303_v25, %v136_v24 }
 0x155   :  { %v314_v28 = vmul.f32 %v353_v23, %v312_v20 }
 0x156   :  { %v315_v29 = vmul.f32 %v354_v26, %v312_v20 }
 0x157   :  { %v322_v30 = vadd.f32 %v320_v27, %v314_v28 }
 0x158   :  { %v323_v31 = vadd.f32 %v320_v27, %v315_v29 }
 0x159   :  { %v324_v32 = vmax.f32 %v322_v30, 0.0 }
 0x15a   :  { %v325_v33 = vmax.f32 %v323_v31, 0.0 }
 0x15c   :  { %v328_v34 = vcombine.low %v324_v32, %v325_v33 }
 0x15e   :  { %330 = vst [vmem:[%s436_s5] sm:$0xff] %v328_v34 }

// kernel: conv_block.6
= control target key start
LH: loop header
LB: loop body
LE: loop exit
PB: predicated region body
PF: predicated region fallthrough
CT: control target
= control target key end

     0   :  { %vm59_vm0 = vcmask 1043456   ;;  %v374_v2 = vmov 0.0   ;;  %s375_s19 = smov 124   ;;  %s376_s20 = smov 126   ;;  %vm55_vm1 = vcmask 31744   ;;  %vm221_vm2 = vcmask 1014784   ;;  %s448_s1 = inlined_call_operand.vmem [shape: f32[4,384], index: 1, kind: input, shape index: {}, may-alias: {0,1}]   ;;  %s449_s0 = inlined_call_operand.vmem [shape: f32[4,384], index: 0, kind: input, shape index: {}, may-alias: {0,1}]   ;;  %s450_s2 = inlined_call_operand.vmem [shape: f32[3,8,4], index: 2, kind: input, shape index: {}]   ;;  %s451_s3 = inlined_call_operand.vmem [shape: f32[8,1], index: 3, kind: output, shape index: {0}]   ;;  %s452_s4 = inlined_call_operand.vmem [shape: f32[8,1], index: 4, kind: output, shape index: {1}]  }
   0x1   :  { %v355_v0 = vld [vmem:[%s448_s1 + $0x8] sm:$0xf]  ;;  %v38_v1 = vld [vmem:[%s449_s0] sm:$0xff]  ;;  %206 = vmatprep.mubr.f32.mxu0 %v374_v2  ;;  %128 = vmatprep.mubr.f32.mxu1 %v374_v2  ;;  %vm52_vm3 = vcmask 1031168   ;;  %v363_v14 = vld [vmem:[%s450_s2 + $0x10] sm:$0xff]  ;;  %vm323_vm4 = vcmask 7168   ;;  %v311_v17 = vlaneseq }
   0x2   :  { %219 = vrot.lane.b32.xlu1 %v355_v0, %s375_s19  ;;  %50 = vrot.lane.b32.xlu0 %v355_v0, %s376_s20  ;;  %v41_v3 = vcombine.high %v38_v1, %v38_v1  ;;  %v42_v4 = vld [vmem:[%s450_s2] sm:$0xff]  ;;  %v356_v13 = vld [vmem:[%s450_s2 + $0x8] sm:$0xff] }
   0x3   :  { %324 = vst.msk [vmem:[%s451_s3] sm:$0xff] %vm323_vm4, %v374_v2  ;;  %v312_v18 = vand.u32 127, %v311_v17  ;;  %325 = vst.msk [vmem:[%s452_s4] sm:$0xff] %vm323_vm4, %v374_v2 }
   0x4   :  { %360 = vmatprep.subr.msk.mxu0 %vm59_vm0, %v41_v3 }
   0x5   :  { %361 = vmatpush1.msk.msra.mxu0 %vm59_vm0, %v38_v1  ;;  %vm315_vm5 = vcmp.lt.s32.totalorder %v312_v18, 32 }
   0x6   :  { %217 = vrot.lane.b32.xlu1 %v41_v3, %s375_s19  ;;  %48 = vrot.lane.b32.xlu0 %v41_v3, %s376_s20 }
   0x7   :  { %362 = vmatmul.mubr.msk.f32.vlgmr.msra.gmra.mrb[0].mxu0 %vm55_vm1, %v42_v4 }
   0x8   :  { %295 = vmatprep.mubr.f32.mxu0 %v374_v2 }
   0xa   :  { %215 = vrot.lane.b32.xlu1 %v38_v1, %s375_s19  ;;  %46 = vrot.lane.b32.xlu0 %v38_v1, %s376_s20  ;;  %v326_v26 = vld [vmem:[%s451_s3] sm:$0xff] }
   0xb   :  { %v333_v28 = vld [vmem:[%s452_s4] sm:$0xff] }
  0x74   :  { %v220_v5 = vpop.permute.xlu1 %219  ;;  %v51_v6 = vpop.permute.xlu0 %50 }
  0x78   :  { %v218_v7 = vpop.permute.xlu1 %217  ;;  %v49_v8 = vpop.permute.xlu0 %48 }
  0x79   :  { %v223_v9 = vsel %vm221_vm2, %v218_v7, %v220_v5  ;;  %v54_v10 = vsel %vm52_vm3, %v49_v8, %v51_v6 }
  0x7a   :  { %364 = vmatprep.subr.msk.mxu0 %vm59_vm0, %v223_v9  ;;  %357 = vmatprep.subr.msk.mxu1 %vm59_vm0, %v54_v10 }
  0x7c   :  { %v216_v11 = vpop.permute.xlu1 %215  ;;  %v47_v12 = vpop.permute.xlu0 %46 }
  0x7d   :  { %v222_v15 = vsel %vm221_vm2, %v216_v11, %v218_v7  ;;  %v53_v16 = vsel %vm52_vm3, %v47_v12, %v49_v8 }
  0x7e   :  { %358 = vmatpush1.msk.msra.mxu1 %vm59_vm0, %v53_v16  ;;  %365 = vmatpush1.msk.msra.mxu0 %vm59_vm0, %v222_v15 }
  0x7f   :  { %359 = vmatmul.mubr.msk.f32.vlgmr.msra.gmra.mrb[0].mxu1 %vm55_vm1, %v356_v13  ;;  %366 = vmatmul.mubr.msk.f32.vlgmr.msra.gmra.mrb[0].mxu0 %vm55_vm1, %v363_v14 }
 0x152   :  { %v130_v19 = vpop.f32.mrb[0].mxu1  ;;  %v297_v20 = vpop.f32.mrb[0].mxu0 }
 0x153   :  { %v367_v21 = vadd.f32 %v297_v20, %v130_v19  ;;  %v299_v22 = vpop.f32.mrb[1].mxu0  ;;  %v132_v23 = vpop.f32.mrb[1].mxu1 }
 0x155   :  { %v317_v24 = vsel %vm315_vm5, %v367_v21, 0.0 }
 0x156   :  { %328 = vadd.xlane.f32.xlu0 %v317_v24  ;;  %v334_v25 = vmul.f32 %v317_v24, %v317_v24 }
 0x158   :  { %337 = vadd.xlane.f32.xlu1 %v334_v25 }
 0x1e3   :  { %v329_v27 = vpop.xlane.xlu0 %328 }
 0x1e4   :  { %v330_v29 = vadd.f32 %v329_v27, %v326_v26 }
 0x1e5   :  { %v338_v30 = vpop.xlane.xlu1 %337 }
 0x1e6   :  { %332 = vst.msk [vmem:[%s451_s3] sm:$0xff] %vm323_vm4, %v330_v29  ;;  %v339_v31 = vadd.f32 %v338_v30, %v333_v28 }
 0x1e8   :  { %340 = vst.msk [vmem:[%s452_s4] sm:$0xff] %vm323_vm4, %v339_v31 }

// kernel: conv_block.4
= control target key start
LH: loop header
LB: loop body
LE: loop exit
PB: predicated region body
PF: predicated region fallthrough
CT: control target
= control target key end

     0   :  { %vm59_vm0 = vcmask 1043456   ;;  %v378_v2 = vmov 0.0   ;;  %s379_s19 = smov 124   ;;  %s380_s20 = smov 126   ;;  %vm55_vm1 = vcmask 31744   ;;  %vm221_vm2 = vcmask 1014784   ;;  %s454_s1 = inlined_call_operand.vmem [shape: f32[4,384], index: 1, kind: input, shape index: {}, may-alias: {0,1}]   ;;  %s455_s0 = inlined_call_operand.vmem [shape: f32[4,384], index: 0, kind: input, shape index: {}, may-alias: {0,1}]   ;;  %s456_s2 = inlined_call_operand.vmem [shape: f32[3,4,4], index: 2, kind: input, shape index: {}]   ;;  %s457_s3 = inlined_call_operand.vmem [shape: f32[4,1], index: 3, kind: output, shape index: {0}]   ;;  %s458_s4 = inlined_call_operand.vmem [shape: f32[4,1], index: 4, kind: output, shape index: {1}]  }
   0x1   :  { %v359_v0 = vld [vmem:[%s454_s1 + $0x8] sm:$0xf]  ;;  %v38_v1 = vld [vmem:[%s455_s0] sm:$0xff]  ;;  %206 = vmatprep.mubr.f32.mxu0 %v378_v2  ;;  %128 = vmatprep.mubr.f32.mxu1 %v378_v2  ;;  %vm52_vm3 = vcmask 1031168   ;;  %vm323_vm4 = vcmask 3072   ;;  %v311_v17 = vlaneseq }
   0x2   :  { %219 = vrot.lane.b32.xlu1 %v359_v0, %s379_s19  ;;  %50 = vrot.lane.b32.xlu0 %v359_v0, %s380_s20  ;;  %v41_v3 = vcombine.high %v38_v1, %v38_v1  ;;  %v42_v4 = vld [vmem:[%s456_s2] sm:$0xf]  ;;  %v360_v13 = vld [vmem:[%s456_s2 + $0x4] sm:$0xf] }
   0x3   :  { %v367_v14 = vld [vmem:[%s456_s2 + $0x8] sm:$0xf]  ;;  %324 = vst.msk [vmem:[%s457_s3] sm:$0xf] %vm323_vm4, %v378_v2  ;;  %v312_v18 = vand.u32 127, %v311_v17 }
   0x4   :  { %364 = vmatprep.subr.msk.mxu0 %vm59_vm0, %v41_v3  ;;  %325 = vst.msk [vmem:[%s458_s4] sm:$0xf] %vm323_vm4, %v378_v2 }
   0x5   :  { %365 = vmatpush1.msk.msra.mxu0 %vm59_vm0, %v38_v1  ;;  %vm315_vm5 = vcmp.lt.s32.totalorder %v312_v18, 32 }
   0x6   :  { %217 = vrot.lane.b32.xlu1 %v41_v3, %s379_s19  ;;  %48 = vrot.lane.b32.xlu0 %v41_v3, %s380_s20 }
   0x7   :  { %366 = vmatmul.mubr.msk.f32.vlgmr.msra.gmra.mrb[0].mxu0 %vm55_vm1, %v42_v4 }
   0x8   :  { %295 = vmatprep.mubr.f32.mxu0 %v378_v2 }
   0xa   :  { %215 = vrot.lane.b32.xlu1 %v38_v1, %s379_s19  ;;  %46 = vrot.lane.b32.xlu0 %v38_v1, %s380_s20  ;;  %v326_v28 = vld [vmem:[%s457_s3] sm:$0xf] }
   0xb   :  { %v335_v30 = vld [vmem:[%s458_s4] sm:$0xf] }
  0x74   :  { %v220_v5 = vpop.permute.xlu1 %219  ;;  %v51_v6 = vpop.permute.xlu0 %50 }
  0x78   :  { %v218_v7 = vpop.permute.xlu1 %217  ;;  %v49_v8 = vpop.permute.xlu0 %48 }
  0x79   :  { %v223_v9 = vsel %vm221_vm2, %v218_v7, %v220_v5  ;;  %v54_v10 = vsel %vm52_vm3, %v49_v8, %v51_v6 }
  0x7a   :  { %368 = vmatprep.subr.msk.mxu0 %vm59_vm0, %v223_v9  ;;  %361 = vmatprep.subr.msk.mxu1 %vm59_vm0, %v54_v10 }
  0x7c   :  { %v216_v11 = vpop.permute.xlu1 %215  ;;  %v47_v12 = vpop.permute.xlu0 %46 }
  0x7d   :  { %v222_v15 = vsel %vm221_vm2, %v216_v11, %v218_v7  ;;  %v53_v16 = vsel %vm52_vm3, %v47_v12, %v49_v8 }
  0x7e   :  { %362 = vmatpush1.msk.msra.mxu1 %vm59_vm0, %v53_v16  ;;  %369 = vmatpush1.msk.msra.mxu0 %vm59_vm0, %v222_v15 }
  0x7f   :  { %363 = vmatmul.mubr.msk.f32.vlgmr.msra.gmra.mrb[0].mxu1 %vm55_vm1, %v360_v13  ;;  %370 = vmatmul.mubr.msk.f32.vlgmr.msra.gmra.mrb[0].mxu0 %vm55_vm1, %v367_v14 }
 0x152   :  { %v130_v19 = vpop.f32.mrb[0].mxu1  ;;  %v297_v20 = vpop.f32.mrb[0].mxu0 }
 0x153   :  { %v371_v21 = vadd.f32 %v297_v20, %v130_v19  ;;  %v299_v22 = vpop.f32.mrb[1].mxu0  ;;  %v132_v23 = vpop.f32.mrb[1].mxu1 }
 0x155   :  { %v317_v24 = vsel %vm315_vm5, %v371_v21, 0.0 }
 0x156   :  { %v327_v25 = vsel %vm59_vm0, %v317_v24, 0.0  ;;  %v336_v26 = vmul.f32 %v317_v24, %v317_v24 }
 0x157   :  { %330 = vadd.xlane.f32.xlu0 %v327_v25 }
 0x158   :  { %v338_v27 = vsel %vm59_vm0, %v336_v26, 0.0 }
 0x159   :  { %341 = vadd.xlane.f32.xlu1 %v338_v27 }
 0x1e4   :  { %v331_v29 = vpop.xlane.xlu0 %330 }
 0x1e5   :  { %v332_v31 = vadd.f32 %v331_v29, %v326_v28 }
 0x1e6   :  { %v342_v32 = vpop.xlane.xlu1 %341 }
 0x1e7   :  { %334 = vst.msk [vmem:[%s457_s3] sm:$0xf] %vm323_vm4, %v332_v31  ;;  %v343_v33 = vadd.f32 %v342_v32, %v335_v30 }
 0x1e9   :  { %344 = vst.msk [vmem:[%s458_s4] sm:$0xf] %vm323_vm4, %v343_v33 }

// kernel: conv_block.7
= control target key start
LH: loop header
LB: loop body
LE: loop exit
PB: predicated region body
PF: predicated region fallthrough
CT: control target
= control target key end

     0   :  { %vm63_vm0 = vcmask 1043456   ;;  %v361_v2 = vmov 0.0   ;;  %s362_s22 = smov 124   ;;  %s363_s23 = smov 126   ;;  %v364_v4 = vmov 0   ;;  %vm59_vm1 = vcmask 31744   ;;  %s431_s1 = inlined_call_operand.vmem [shape: f32[4,384], index: 1, kind: input, shape index: {}, may-alias: {0,1}]   ;;  %s432_s0 = inlined_call_operand.vmem [shape: f32[4,384], index: 0, kind: input, shape index: {}, may-alias: {0,1}]   ;;  %s433_s2 = inlined_call_operand.vmem [shape: f32[3,8,4], index: 2, kind: input, shape index: {}]   ;;  %s434_s3 = inlined_call_operand.vmem [shape: f32[8,1], index: 3, kind: input, shape index: {}]   ;;  %s435_s4 = inlined_call_operand.vmem [shape: f32[8,1], index: 4, kind: input, shape index: {}]   ;;  %s436_s5 = inlined_call_operand.vmem [shape: f32[8,256], index: 5, kind: output, shape index: {}]  }
   0x1   :  { %v338_v0 = vld [vmem:[%s431_s1 + $0x8] sm:$0xf]  ;;  %v42_v1 = vld [vmem:[%s432_s0] sm:$0xff]  ;;  %210 = vmatprep.mubr.f32.mxu0 %v361_v2  ;;  %132 = vmatprep.mubr.f32.mxu1 %v361_v2  ;;  %vm225_vm2 = vcmask 1014784   ;;  %vm56_vm3 = vcmask 1031168   ;;  %v346_v17 = vld [vmem:[%s433_s2 + $0x10] sm:$0xff] }
   0x2   :  { %223 = vrot.lane.b32.xlu1 %v338_v0, %s362_s22  ;;  %54 = vrot.lane.b32.xlu0 %v338_v0, %s363_s23  ;;  %v45_v3 = vcombine.high %v42_v1, %v42_v1  ;;  %v46_v5 = vld [vmem:[%s433_s2] sm:$0xff]  ;;  %v339_v16 = vld [vmem:[%s433_s2 + $0x8] sm:$0xff] }
   0x3   :  { %358 = vset.pattern.permute.xlu0 %v364_v4  ;;  %359 = vset.pattern.permute.xlu1 %v364_v4  ;;  %v308_v6 = vld [vmem:[%s434_s3] sm:$0xff] }
   0x4   :  { %343 = vmatprep.subr.msk.mxu0 %vm63_vm0, %v45_v3  ;;  %v316_v7 = vld [vmem:[%s435_s4] sm:$0xff] }
   0x5   :  { %344 = vmatpush1.msk.msra.mxu0 %vm63_vm0, %v42_v1 }
   0x6   :  { %221 = vrot.lane.b32.xlu1 %v45_v3, %s362_s22  ;;  %52 = vrot.lane.b32.xlu0 %v45_v3, %s363_s23 }
   0x7   :  { %345 = vmatmul.mubr.msk.f32.vlgmr.msra.gmra.mrb[0].mxu0 %vm59_vm1, %v46_v5 }
   0x8   :  { %299 = vmatprep.mubr.f32.mxu0 %v361_v2 }
   0xa   :  { %219 = vrot.lane.b32.xlu1 %v42_v1, %s362_s22  ;;  %50 = vrot.lane.b32.xlu0 %v42_v1, %s363_s23 }
   0xe   :  { %311 = vperm.xlu0 %358, %v308_v6   ;;  %319 = vperm.xlu1 %359, %v316_v7  }
  0x74   :  { %v224_v8 = vpop.permute.xlu1 %223  ;;  %v55_v9 = vpop.permute.xlu0 %54 }
  0x78   :  { %v222_v10 = vpop.permute.xlu1 %221  ;;  %v53_v11 = vpop.permute.xlu0 %52 }
  0x79   :  { %v227_v12 = vsel %vm225_vm2, %v222_v10, %v224_v8  ;;  %v58_v13 = vsel %vm56_vm3, %v53_v11, %v55_v9 }
  0x7a   :  { %347 = vmatprep.subr.msk.mxu0 %vm63_vm0, %v227_v12  ;;  %340 = vmatprep.subr.msk.mxu1 %vm63_vm0, %v58_v13 }
  0x7c   :  { %v220_v14 = vpop.permute.xlu1 %219  ;;  %v51_v15 = vpop.permute.xlu0 %50 }
  0x7d   :  { %v226_v18 = vsel %vm225_vm2, %v220_v14, %v222_v10  ;;  %v57_v19 = vsel %vm56_vm3, %v51_v15, %v53_v11 }
  0x7e   :  { %341 = vmatpush1.msk.msra.mxu1 %vm63_vm0, %v57_v19  ;;  %348 = vmatpush1.msk.msra.mxu0 %vm63_vm0, %v226_v18 }
  0x7f   :  { %342 = vmatmul.mubr.msk.f32.vlgmr.msra.gmra.mrb[0].mxu1 %vm59_vm1, %v339_v16  ;;  %349 = vmatmul.mubr.msk.f32.vlgmr.msra.gmra.mrb[0].mxu0 %vm59_vm1, %v346_v17 }
  0x8d   :  { %v312_v20 = vpop.permute.xlu0 %311  ;;  %v320_v27 = vpop.permute.xlu1 %319 }
 0x152   :  { %v134_v21 = vpop.f32.mrb[0].mxu1  ;;  %v301_v22 = vpop.f32.mrb[0].mxu0 }
 0x153   :  { %v350_v23 = vadd.f32 %v301_v22, %v134_v21  ;;  %v136_v24 = vpop.f32.mrb[1].mxu1  ;;  %v303_v25 = vpop.f32.mrb[1].mxu0 }
 0x154   :  { %v351_v26 = vadd.f32 %v303_v25, %v136_v24 }
 0x155   :  { %v314_v28 = vmul.f32 %v350_v23, %v312_v20 }
 0x156   :  { %v315_v29 = vmul.f32 %v351_v26, %v312_v20 }
 0x157   :  { %v322_v30 = vadd.f32 %v320_v27, %v314_v28 }
 0x158   :  { %v323_v31 = vadd.f32 %v320_v27, %v315_v29 }
 0x159   :  { %v324_v32 = vmax.f32 %v322_v30, 0.0 }
 0x15a   :  { %v325_v33 = vmax.f32 %v323_v31, 0.0 }
 0x15b   :  { %326 = vst [vmem:[%s436_s5] sm:$0xff] %v324_v32 }
 0x15c   :  { %327 = vst [vmem:[%s436_s5 + $0x8] sm:$0xff] %v325_v33 }

</bundles_post_ra>
